<compile_context>
chip_gen: v6e
topology: v6e:2x2x1
jax: 0.10.0
libtpu: 0.0.40
codegen_flags: <defaults>
</compile_context>

<pallas_src>
from typing import NamedTuple

import jax
import jax.numpy as jnp
from jax.experimental import pallas as pl
from jax.experimental.pallas import tpu as pltpu


def _round_up(x, m):
    return ((x + m - 1) // m) * m


def _device_kind():
    try:
        return jax.devices()[0].device_kind.lower()
    except Exception:
        return ""


def _vmem_budget_bytes():
    """Usable per-TensorCore VMEM budget (physical capacity minus ~10%)."""
    kind = _device_kind()
    if any(tag in kind for tag in ("v4", "v5", "v6")):
        cap = 128 * 1024 * 1024
    else:
        # v7x has 64 MiB per TensorCore; also the safe default for unknown HW.
        cap = 64 * 1024 * 1024
    return int(cap * 0.90)


# ---------------------------------------------------------------------------
# Kernels
# ---------------------------------------------------------------------------
def ffn_resident_kernel(x_ref, w1_ref, b1_ref, w2_ref, b2_ref, o_ref):
    """Weights fully resident in VMEM; grid = (M tiles,)."""
    h = jnp.dot(x_ref[...], w1_ref[...], preferred_element_type=jnp.float32)
    h = jnp.maximum(h + b1_ref[...], 0.0)          # bias + ReLU in f32
    # (dropout == identity at inference)
    out = jnp.dot(h.astype(w2_ref.dtype), w2_ref[...],
                  preferred_element_type=jnp.float32)
    o_ref[...] = (out + b2_ref[...]).astype(o_ref.dtype)


def ffn_streaming_kernel(x_ref, w1_ref, b1_ref, w2_ref, b2_ref, o_ref, acc_ref):
    """d_ff streamed in slabs; grid = (M tiles, d_ff slabs)."""
    f = pl.program_id(1)

    @pl.when(f == 0)
    def _():
        acc_ref[...] = jnp.zeros_like(acc_ref)

    # First linear on the current d_ff slab: (tm, d_model_p) @ (d_model_p, tf)
    h = jnp.dot(x_ref[...], w1_ref[...], preferred_element_type=jnp.float32)
    h = jnp.maximum(h + b1_ref[...], 0.0)          # bias + ReLU in f32
    # Second linear, accumulated over d_ff slabs: (tm, tf) @ (tf, d_model_p)
    acc_ref[...] += jnp.dot(h.astype(w2_ref.dtype), w2_ref[...],
                            preferred_element_type=jnp.float32)

    @pl.when(f == pl.num_programs(1) - 1)
    def _():
        o_ref[...] = (acc_ref[...] + b2_ref[...]).astype(o_ref.dtype)


# ---------------------------------------------------------------------------
# Parameter preparation (hoisted pad + cast)
# ---------------------------------------------------------------------------
class FFNParams(NamedTuple):
    w1: jax.Array       # (d_model_p, d_ff_p), compute dtype
    b1: jax.Array       # (1, d_ff_p), f32
    w2: jax.Array       # (d_ff_p, d_model_p), compute dtype
    b2: jax.Array       # (1, d_model_p), f32
    d_model: int
    d_ff: int


def prepare_ffn_params(w1, b1, w2, b2, *, compute_dtype=jnp.bfloat16):
    """Pad weights to 128-aligned shapes and cast to the compute dtype ONCE.

    Do this at weight-load time and reuse across forward calls so the pad/cast
    does not re-materialize full weight copies in HBM on every call.  bf16 is
    the default compute dtype (recommended on v5e/v6e/v7x MXUs); pass
    compute_dtype=jnp.float32 for exact parity with the f32 PyTorch module.
    Zero padding is mathematically exact for this FFN.
    """
    d_model, d_ff = w1.shape
    assert w2.shape == (d_ff, d_model)
    cdtype = jnp.dtype(compute_dtype)
    d_model_p = _round_up(d_model, 128)
    d_ff_p = _round_up(d_ff, 128)

    def prep_w(w, rows_p, cols_p):
        if w.dtype != cdtype:
            w = w.astype(cdtype)
        pr, pc = rows_p - w.shape[0], cols_p - w.shape[1]
        if pr or pc:
            w = jnp.pad(w, ((0, pr), (0, pc)))
        return w

    def prep_b(b, n_p):
        b = b.astype(jnp.float32)
        if n_p != b.shape[0]:
            b = jnp.pad(b, ((0, n_p - b.shape[0]),))
        return b.reshape(1, n_p)

    return FFNParams(
        w1=prep_w(w1, d_model_p, d_ff_p),
        b1=prep_b(b1, d_ff_p),
        w2=prep_w(w2, d_ff_p, d_model_p),
        b2=prep_b(b2, d_model_p),
        d_model=d_model,
        d_ff=d_ff,
    )


def _pick_tf(d_ff_p, tf):
    """Largest multiple of 128 that is <= tf and divides d_ff_p."""
    tf = max(128, min(tf, d_ff_p))
    for k in range(tf // 128, 0, -1):
        cand = k * 128
        if d_ff_p % cand == 0:
            return cand
    return 128


# ---------------------------------------------------------------------------
# Forward
# ---------------------------------------------------------------------------
def ffn_apply(x, params: FFNParams, *, tm=None, tf=None, weight_buffers=None,
              force_streaming=False, out_dtype=None):
    """FFN forward: x (batch, seq, d_model) -> (batch, seq, d_model)."""
    B, S, d_model = x.shape
    assert d_model == params.d_model, "x feature dim must match d_model"
    d_ff = params.d_ff
    w1_p, b1_p, w2_p, b2_p = params.w1, params.b1, params.w2, params.b2
    d_model_p, d_ff_p = w1_p.shape
    cdtype = w1_p.dtype
    out_dtype = jnp.dtype(out_dtype) if out_dtype is not None else x.dtype
    it = jnp.dtype(cdtype).itemsize
    ot = jnp.dtype(out_dtype).itemsize

    M = B * S
    budget = _vmem_budget_bytes()

    # --- M-tile geometry ----------------------------------------------------
    if tm is None:
        tm = 1024 if M >= 4096 else 512        # raised defaults (perf review)
    tm_eff = min(tm, _round_up(M, 8))
    # When tm < M <= 2*tm there are 2 M tiles either way; split them evenly to
    # cut padded compute and keep both v7x TensorCores busy on the parallel
    # axis.  (On v5e/v6e this is neutral.)
    if tm_eff < M <= 2 * tm_eff:
        tm_eff = _round_up((M + 1) // 2, 8)
    M_p = _round_up(M, tm_eff)

    if weight_buffers is None:
        kind = _device_kind()
        # v5e: lowest HBM BW -> a 3rd weight-slab buffer smooths exposed DMA.
        weight_buffers = 3 if ("v5e" in kind or "v5 lite" in kind) else 2

    # --- pick kernel variant against the VMEM budget -------------------------
    fast_est = (
        2 * tm_eff * d_model_p * it            # x tile (double-buffered)
        + 2 * tm_eff * d_model_p * ot          # out tile (double-buffered)
        + 2 * d_model_p * d_ff_p * it          # w1 (buffer pair, DMA'd once)
        + 2 * d_ff_p * d_model_p * it          # w2 (buffer pair, DMA'd once)
        + 2 * (d_ff_p + d_model_p) * 4         # biases (f32, tiny)
        + tm_eff * d_ff_p * 4                  # h intermediate (f32)
        + tm_eff * d_model_p * 4               # f32 result before cast
    )
    use_fast = (not force_streaming) and int(1.15 * fast_est) <= budget

    if not use_fast:
        if tf is None:
            tf = 1024                          # raised default (perf review)
        tf_eff = _pick_tf(d_ff_p, tf)

        def stream_est(tm_e, tf_e):
            return (2 * tm_e * d_model_p * it              # x tile
                    + 2 * tm_e * d_model_p * ot            # out tile
                    + weight_buffers * d_model_p * tf_e * it   # w1 slabs
                    + weight_buffers * tf_e * d_model_p * it   # w2 slabs
                    + 2 * (tf_e + d_model_p) * 4           # biases
                    + tm_e * d_model_p * 4                 # f32 accumulator
                    + tm_e * tf_e * 4)                     # h intermediate

        # Shrink tiles if needed so the scoped VMEM request stays in budget
        # (matters most on v7x's 64 MiB per TensorCore).
        while int(1.25 * stream_est(tm_eff, tf_eff)) > budget and tf_eff > 256:
            new_tf = _pick_tf(d_ff_p, tf_eff // 2)
            if new_tf == tf_eff:
                break
            tf_eff = new_tf
        while int(1.25 * stream_est(tm_eff, tf_eff)) > budget and tm_eff > 128:
            tm_eff = _round_up(tm_eff // 2, 8)
            M_p = _round_up(M, tm_eff)

        stream_vmem = min(max(int(1.25 * stream_est(tm_eff, tf_eff)),
                              32 * 1024 * 1024), budget)

    # --- pad activations (per call; weights already prepared) ----------------
    x2d = x.reshape(M, d_model)
    if x2d.dtype != cdtype:
        x2d = x2d.astype(cdtype)
    if (M_p - M) or (d_model_p - d_model):
        x2d = jnp.pad(x2d, ((0, M_p - M), (0, d_model_p - d_model)))

    # --- advisory cost estimate (logical, unpadded sizes) ---------------------
    flops = 4 * M * d_model * d_ff             # two GEMMs
    bytes_accessed = int(M * d_model * (it + ot)
                         + 2 * d_model * d_ff * it
                         + (d_ff + d_model) * 4)
    cost = pl.CostEstimate(flops=flops, transcendentals=0,
                           bytes_accessed=bytes_accessed)

    if use_fast:
        vmem_limit = min(max(int(1.2 * fast_est), 32 * 1024 * 1024), budget)
        out2d = pl.pallas_call(
            ffn_resident_kernel,
            out_shape=jax.ShapeDtypeStruct((M_p, d_model_p), out_dtype),
            grid_spec=pltpu.PrefetchScalarGridSpec(
                num_scalar_prefetch=0,
                grid=(M_p // tm_eff,),
                in_specs=[
                    pl.BlockSpec((tm_eff, d_model_p), lambda i: (i, 0)),   # x
                    pl.BlockSpec((d_model_p, d_ff_p), lambda i: (0, 0)),   # w1
                    pl.BlockSpec((1, d_ff_p), lambda i: (0, 0)),           # b1
                    pl.BlockSpec((d_ff_p, d_model_p), lambda i: (0, 0)),   # w2
                    pl.BlockSpec((1, d_model_p), lambda i: (0, 0)),        # b2
                ],
                out_specs=pl.BlockSpec((tm_eff, d_model_p), lambda i: (i, 0)),
            ),
            compiler_params=pltpu.CompilerParams(
                dimension_semantics=("parallel",),
                vmem_limit_bytes=vmem_limit),
            cost_estimate=cost,
        )(x2d, w1_p, b1_p, w2_p, b2_p)
    else:
        w_kw = ({"pipeline_mode": pl.Buffered(weight_buffers)}
                if weight_buffers != 2 else {})
        out2d = pl.pallas_call(
            ffn_streaming_kernel,
            out_shape=jax.ShapeDtypeStruct((M_p, d_model_p), out_dtype),
            grid_spec=pltpu.PrefetchScalarGridSpec(
                num_scalar_prefetch=0,
                grid=(M_p // tm_eff, d_ff_p // tf_eff),
                in_specs=[
                    pl.BlockSpec((tm_eff, d_model_p), lambda i, f: (i, 0)),
                    pl.BlockSpec((d_model_p, tf_eff), lambda i, f: (0, f), **w_kw),
                    pl.BlockSpec((1, tf_eff), lambda i, f: (0, f)),
                    pl.BlockSpec((tf_eff, d_model_p), lambda i, f: (f, 0), **w_kw),
                    pl.BlockSpec((1, d_model_p), lambda i, f: (0, 0)),
                ],
                out_specs=pl.BlockSpec((tm_eff, d_model_p), lambda i, f: (i, 0)),
                scratch_shapes=[pltpu.VMEM((tm_eff, d_model_p), jnp.float32)],
            ),
            compiler_params=pltpu.CompilerParams(
                dimension_semantics=("parallel", "arbitrary"),
                vmem_limit_bytes=stream_vmem),
            cost_estimate=cost,
        )(x2d, w1_p, b1_p, w2_p, b2_p)

    return out2d[:M, :d_model].reshape(B, S, d_model)


def positionwise_feed_forward(x, w1, b1, w2, b2, *,
                              compute_dtype=jnp.bfloat16, **apply_kwargs):
    """One-shot convenience wrapper (pads/casts weights per call).

    For repeated forward calls, call prepare_ffn_params() once and reuse the
    result with ffn_apply() instead.
    """
    params = prepare_ffn_params(w1, b1, w2, b2, compute_dtype=compute_dtype)
    return ffn_apply(x, params, **apply_kwargs)


if __name__ == "__main__":
    # Small shapes consistent with the module: tokens of width d_model,
    # hidden expansion d_ff.
    batch, seq, d_model, d_ff = 2, 8, 32, 64

    key = jax.random.PRNGKey(0)
    kx, kw1, kb1, kw2, kb2 = jax.random.split(key, 5)

    x = jax.random.normal(kx, (batch, seq, d_model), dtype=jnp.float32)
    # nn.Linear(d_model, d_ff) / nn.Linear(d_ff, d_model) weights, stored
    # transposed for x @ w.
    w1 = jax.random.normal(kw1, (d_model, d_ff), dtype=jnp.float32) * 0.1
    b1 = jax.random.normal(kb1, (d_ff,), dtype=jnp.float32) * 0.1
    w2 = jax.random.normal(kw2, (d_ff, d_model), dtype=jnp.float32) * 0.1
    b2 = jax.random.normal(kb2, (d_model,), dtype=jnp.float32) * 0.1

    ref = jnp.maximum(x @ w1 + b1, 0.0) @ w2 + b2

    # f32 compute: exact parity with the PyTorch module in eval() mode.
    out_f32 = positionwise_feed_forward(x, w1, b1, w2, b2,
                                        compute_dtype=jnp.float32)
    jax.block_until_ready(out_f32)
    assert out_f32.shape == (batch, seq, d_model)
    assert jnp.allclose(out_f32, ref, atol=1e-4, rtol=1e-4)

    # Default bf16 compute path (recommended on v5e/v6e/v7x; f32 accumulation),
    # with weight pad/cast hoisted out of the per-call path.
    params_bf16 = prepare_ffn_params(w1, b1, w2, b2)      # bf16 default
    out_bf16 = ffn_apply(x, params_bf16)
    jax.block_until_ready(out_bf16)
    assert jnp.allclose(out_bf16, ref, atol=5e-2, rtol=5e-2)

    # Also exercise the streaming (d_ff-slab accumulation) kernel explicitly.
    params_f32 = prepare_ffn_params(w1, b1, w2, b2, compute_dtype=jnp.float32)
    out_stream = ffn_apply(x, params_f32, force_streaming=True)
    jax.block_until_ready(out_stream)
    assert jnp.allclose(out_stream, ref, atol=1e-4, rtol=1e-4)

    print("KERNEL_OK")
</pallas_src>

<mosaic_0001>
module attributes {stable_mosaic.version = 11 : i64} {
  func.func @ffn_resident_kernel(%arg0: i32, %arg1: memref<16x128xf32, #tpu.memory_space<vmem>>, %arg2: memref<128x128xf32, #tpu.memory_space<vmem>>, %arg3: memref<1x128xf32, #tpu.memory_space<vmem>>, %arg4: memref<128x128xf32, #tpu.memory_space<vmem>>, %arg5: memref<1x128xf32, #tpu.memory_space<vmem>>, %arg6: memref<16x128xf32, #tpu.memory_space<vmem>>) attributes {dimension_semantics = [#tpu.dimension_semantics<parallel>], iteration_bounds = array<i64: 1>, scalar_prefetch = 0 : i64, scratch_operands = 0 : i64, tpu.core_type = #tpu.core_type<tc>, window_params = [{transform_indices = @transform_0, window_bounds = array<i64: 16, 128>}, {pipeline_mode = #tpu.pipeline_mode<synchronous>, transform_indices = @transform_1, window_bounds = array<i64: 128, 128>}, {pipeline_mode = #tpu.pipeline_mode<synchronous>, transform_indices = @transform_2, window_bounds = array<i64: 1, 128>}, {pipeline_mode = #tpu.pipeline_mode<synchronous>, transform_indices = @transform_3, window_bounds = array<i64: 128, 128>}, {pipeline_mode = #tpu.pipeline_mode<synchronous>, transform_indices = @transform_4, window_bounds = array<i64: 1, 128>}, {transform_indices = @transform_5, window_bounds = array<i64: 16, 128>}]} {
    %c0 = arith.constant 0 : index
    %c0_0 = arith.constant 0 : index
    %0 = vector.load %arg1[%c0, %c0_0] : memref<16x128xf32, #tpu.memory_space<vmem>>, vector<16x128xf32>
    %c0_1 = arith.constant 0 : index
    %c0_2 = arith.constant 0 : index
    %1 = vector.load %arg2[%c0_1, %c0_2] : memref<128x128xf32, #tpu.memory_space<vmem>>, vector<128x128xf32>
    %cst = arith.constant dense<0.000000e+00> : vector<16x128xf32>
    %2 = tpu.matmul %0, %1, %cst {dimension_numbers = #tpu.dot_dimension_numbers<[1], [0], [0], [1], [0, 0, 1, 1], [], []>} : vector<16x128xf32>, vector<128x128xf32>, vector<16x128xf32> -> vector<16x128xf32>
    %c0_3 = arith.constant 0 : index
    %c0_4 = arith.constant 0 : index
    %3 = vector.load %arg3[%c0_3, %c0_4] : memref<1x128xf32, #tpu.memory_space<vmem>>, vector<1x128xf32>
    %4 = vector.broadcast %3 : vector<1x128xf32> to vector<16x128xf32>
    %5 = arith.addf %2, %4 : vector<16x128xf32>
    %cst_5 = arith.constant 0.000000e+00 : f32
    %6 = vector.broadcast %cst_5 : f32 to vector<16x128xf32>
    %7 = arith.maximumf %5, %6 : vector<16x128xf32>
    %c0_6 = arith.constant 0 : index
    %c0_7 = arith.constant 0 : index
    %8 = vector.load %arg4[%c0_6, %c0_7] : memref<128x128xf32, #tpu.memory_space<vmem>>, vector<128x128xf32>
    %cst_8 = arith.constant dense<0.000000e+00> : vector<16x128xf32>
    %9 = tpu.matmul %7, %8, %cst_8 {dimension_numbers = #tpu.dot_dimension_numbers<[1], [0], [0], [1], [0, 0, 1, 1], [], []>} : vector<16x128xf32>, vector<128x128xf32>, vector<16x128xf32> -> vector<16x128xf32>
    %c0_9 = arith.constant 0 : index
    %c0_10 = arith.constant 0 : index
    %10 = vector.load %arg5[%c0_9, %c0_10] : memref<1x128xf32, #tpu.memory_space<vmem>>, vector<1x128xf32>
    %11 = vector.broadcast %10 : vector<1x128xf32> to vector<16x128xf32>
    %12 = arith.addf %9, %11 : vector<16x128xf32>
    %c0_11 = arith.constant 0 : index
    %c0_12 = arith.constant 0 : index
    %13 = vector.load %arg6[%c0_11, %c0_12] : memref<16x128xf32, #tpu.memory_space<vmem>>, vector<16x128xf32>
    tpu.vector_store %arg6[%c0_11, %c0_12], %12 {strides = array<i32>} : memref<16x128xf32, #tpu.memory_space<vmem>>, vector<16x128xf32>,
    return
  }
  func.func @transform_0(%arg0: i32) -> (i32, i32) {
    %c0_i32 = arith.constant 0 : i32
    %c0_i32_0 = arith.constant 0 : i32
    return %arg0, %c0_i32 : i32, i32
  }
  func.func @transform_1(%arg0: i32) -> (i32, i32) {
    %c0_i32 = arith.constant 0 : i32
    %c0_i32_0 = arith.constant 0 : i32
    %c0_i32_1 = arith.constant 0 : i32
    return %c0_i32, %c0_i32_0 : i32, i32
  }
  func.func @transform_2(%arg0: i32) -> (i32, i32) {
    %c0_i32 = arith.constant 0 : i32
    %c0_i32_0 = arith.constant 0 : i32
    %c0_i32_1 = arith.constant 0 : i32
    return %c0_i32, %c0_i32_0 : i32, i32
  }
  func.func @transform_3(%arg0: i32) -> (i32, i32) {
    %c0_i32 = arith.constant 0 : i32
    %c0_i32_0 = arith.constant 0 : i32
    %c0_i32_1 = arith.constant 0 : i32
    return %c0_i32, %c0_i32_0 : i32, i32
  }
  func.func @transform_4(%arg0: i32) -> (i32, i32) {
    %c0_i32 = arith.constant 0 : i32
    %c0_i32_0 = arith.constant 0 : i32
    %c0_i32_1 = arith.constant 0 : i32
    return %c0_i32, %c0_i32_0 : i32, i32
  }
  func.func @transform_5(%arg0: i32) -> (i32, i32) {
    %c0_i32 = arith.constant 0 : i32
    %c0_i32_0 = arith.constant 0 : i32
    return %arg0, %c0_i32 : i32, i32
  }
}

</mosaic_0001>

<bundles_post_ra>
// kernel: tpu_custom_call.1
= control target key start
LH: loop header
LB: loop body
LE: loop exit
PB: predicated region body
PF: predicated region fallthrough
CT: control target
= control target key end

     0   :  { %10 = vsyncpa [#allocation3], 0  ;;  %s548_s0 = inlined_call_operand.hbm [shape: f32[16,128], index: 0, kind: input, shape index: {}]   ;;  %s549_s1 = inlined_call_operand.hbm [shape: f32[128,128], index: 1, kind: input, shape index: {}]   ;;  %s550_s2 = inlined_call_operand.vmem [shape: f32[1,128], index: 2, kind: input, shape index: {}]   ;;  %s551_s3 = inlined_call_operand.hbm [shape: f32[128,128], index: 3, kind: input, shape index: {}]   ;;  %s552_s4 = inlined_call_operand.vmem [shape: f32[1,128], index: 4, kind: input, shape index: {}]   ;;  %s553_s5 = inlined_call_operand.hbm [shape: f32[16,128], index: 5, kind: output, shape index: {}]  }
   0x1   :  { %11 = vsyncpa [#allocation6], 0 }
   0x2   :  { %12 = vsyncpa [#allocation4], 0  ;;  %s482_s18 = smov [#allocation5]   ;;  %s483_s20 = smov [#allocation2]  }
   0x3   :  { %s30_s19 = sshll.u32 %s482_s18, 4  ;;  %s18_s21 = sshll.u32 %s483_s20, 4  ;;  %s31_s19 = int_to_ptr.vmem [resolvable:$true] %s30_s19  ;;  %s19_s21 = int_to_ptr.vmem [resolvable:$true] %s18_s21 }
   0x4   :  { %s404_s22 = scalar_lea.vmem %s31_s19, 2048  ;;  %p409_p1 = scmp.lt.s32.totalorder %s31_s19, %s31_s19 }
   0x5   :  { %p405_p0 = scmp.ne.s32.totalorder %s31_s19, %s404_s22  ;;  %p410_p2 = scmp.lt.s32.totalorder %s404_s22, %s404_s22 }
   0x7   :  { %p411_p3 = por %p410_p2, %p409_p1 }
   0x9   :  { %p412_p4 = pnand %p411_p3, %p405_p0 }
   0xb   :  { %415 = shalt.err (!%p412_p4)
}
   0xc   :  { %s484_s23 = smov 128   ;;  %s485_s24 = smov 8  }
   0xd   :  { %36 = dma.hbm_to_vmem [thread:$0]  %s549_s1, 2048, %s31_s19, [#allocation6], %s484_s23, %s484_s23, %s485_s24  }
   0xe   :  { %s424_s27 = scalar_lea.vmem %s19_s21, 256  ;;  %p429_p6 = scmp.lt.s32.totalorder %s19_s21, %s19_s21 }
   0xf   :  { %p425_p5 = scmp.ne.s32.totalorder %s19_s21, %s424_s27  ;;  %p430_p7 = scmp.lt.s32.totalorder %s424_s27, %s424_s27 }
  0x11   :  { %p431_p8 = por %p430_p7, %p429_p6 }
  0x13   :  { %p432_p9 = pnand %p431_p8, %p425_p5 }
  0x15   :  { %435 = shalt.err (!%p432_p9)
}
  0x16   :  { %24 = dma.hbm_to_vmem [thread:$0]  %s548_s0, 256, %s19_s21, [#allocation3], %s484_s23, %s484_s23, %s485_s24  }
  0x17   :  { %s486_s30 = smov [#allocation7]  }
  0x18   :  { %s44_s6 = sshll.u32 %s486_s30, 4  ;;  %s45_s6 = int_to_ptr.vmem [resolvable:$true] %s44_s6 }
  0x19   :  { %s444_s7 = scalar_lea.vmem %s45_s6, 2048  ;;  %p449_p11 = scmp.lt.s32.totalorder %s45_s6, %s45_s6 }
  0x1a   :  { %p445_p10 = scmp.ne.s32.totalorder %s45_s6, %s444_s7  ;;  %p450_p12 = scmp.lt.s32.totalorder %s444_s7, %s444_s7 }
  0x1c   :  { %p451_p13 = por %p450_p12, %p449_p11 }
  0x1e   :  { %p452_p0 = pnand %p451_p13, %p445_p10 }
  0x20   :  { %455 = shalt.err (!%p452_p0)
}
  0x21   :  { %50 = dma.hbm_to_vmem [thread:$0]  %s551_s3, 2048, %s45_s6, [#allocation6], %s484_s23, %s484_s23, %s485_s24  }
  0x22   :  { %476 = dma.done.wait [#allocation3], 256  }
  0x23   :  { %477 = vsyncadd [#allocation3], 4294967040 }
  0x24   :  { %478 = dma.done.wait [#allocation6], 4096  }
  0x25   :  { %479 = vsyncadd [#allocation6], 4294963200  ;;  %v79_v0 = vld [vmem:[#allocation5 + $0x78] sm:$0xff]  ;;  %v78_v1 = vld [vmem:[#allocation5 + $0x70] sm:$0xff]  ;;  %s487_s11 = smov [#allocation8]  }
  0x26   :  { %320 = vmatprep.subr.mxu0 %v79_v0  ;;  %v77_v2 = vld [vmem:[#allocation5 + $0x68] sm:$0xff]  ;;  %v76_v3 = vld [vmem:[#allocation5 + $0x60] sm:$0xff]  ;;  %v62_v4 = vld [vmem:[#allocation2] sm:$0xff]  ;;  %s269_s12 = sshll.u32 %s487_s11, 4  ;;  %s270_s12 = int_to_ptr.vmem [resolvable:$true] %s269_s12 }
  0x27   :  { %321 = vmatpush3.msra.mxu0 %v79_v0  ;;  %v75_v5 = vld [vmem:[#allocation5 + $0x58] sm:$0xff]  ;;  %352 = vmatprep.mubr.f32.mxu0 %v62_v4  ;;  %v178_v7 = vld [vmem:[#allocation7 + $0x70] sm:$0xff]  ;;  %v177_v9 = vld [vmem:[#allocation7 + $0x68] sm:$0xff]  ;;  %p461_p2 = scmp.lt.s32.totalorder %s270_s12, %s270_s12 }
  0x28   :  { %322 = vmatprep.subr.mxu0 %v78_v1  ;;  %v179_v6 = vld [vmem:[#allocation7 + $0x78] sm:$0xff]  ;;  %v74_v8 = vld [vmem:[#allocation5 + $0x50] sm:$0xff]  ;;  %v73_v10 = vld [vmem:[#allocation5 + $0x48] sm:$0xff] }
  0x29   :  { %323 = vmatpush3.msra.mxu0 %v78_v1  ;;  %355 = vmatprep.subr.mxu1 %v179_v6  ;;  %v176_v11 = vld [vmem:[#allocation7 + $0x60] sm:$0xff]  ;;  %v175_v13 = vld [vmem:[#allocation7 + $0x58] sm:$0xff]  ;;  %v174_v15 = vld [vmem:[#allocation7 + $0x50] sm:$0xff] }
  0x2a   :  { %324 = vmatprep.subr.mxu0 %v77_v2  ;;  %356 = vmatpush3.msra.mxu1 %v179_v6  ;;  %v72_v12 = vld [vmem:[#allocation5 + $0x40] sm:$0xff]  ;;  %v71_v14 = vld [vmem:[#allocation5 + $0x38] sm:$0xff]  ;;  %v70_v16 = vld [vmem:[#allocation5 + $0x30] sm:$0xff] }
  0x2b   :  { %325 = vmatpush3.msra.mxu0 %v77_v2  ;;  %357 = vmatprep.subr.mxu1 %v178_v7  ;;  %v173_v17 = vld [vmem:[#allocation7 + $0x48] sm:$0xff]  ;;  %v172_v19 = vld [vmem:[#allocation7 + $0x40] sm:$0xff]  ;;  %v171_v21 = vld [vmem:[#allocation7 + $0x38] sm:$0xff] }
  0x2c   :  { %326 = vmatprep.subr.mxu0 %v76_v3  ;;  %358 = vmatpush3.msra.mxu1 %v178_v7  ;;  %v69_v18 = vld [vmem:[#allocation5 + $0x28] sm:$0xff]  ;;  %v68_v20 = vld [vmem:[#allocation5 + $0x20] sm:$0xff]  ;;  %v67_v22 = vld [vmem:[#allocation5 + $0x18] sm:$0xff] }
  0x2d   :  { %327 = vmatpush3.msra.mxu0 %v76_v3  ;;  %359 = vmatprep.subr.mxu1 %v177_v9  ;;  %v170_v23 = vld [vmem:[#allocation7 + $0x30] sm:$0xff]  ;;  %v169_v25 = vld [vmem:[#allocation7 + $0x28] sm:$0xff]  ;;  %v168_v27 = vld [vmem:[#allocation7 + $0x20] sm:$0xff] }
  0x2e   :  { %328 = vmatprep.subr.mxu0 %v75_v5  ;;  %360 = vmatpush3.msra.mxu1 %v177_v9  ;;  %v66_v24 = vld [vmem:[#allocation5 + $0x10] sm:$0xff]  ;;  %v65_v26 = vld [vmem:[#allocation5 + $0x8] sm:$0xff]  ;;  %v64_v28 = vld [vmem:[#allocation5] sm:$0xff] }
  0x2f   :  { %329 = vmatpush3.msra.mxu0 %v75_v5  ;;  %361 = vmatprep.subr.mxu1 %v176_v11  ;;  %v63_v29 = vld [vmem:[#allocation2 + $0x8] sm:$0xff]  ;;  %v166_v31 = vld [vmem:[#allocation7 + $0x10] sm:$0xff]  ;;  %v165_v32 = vld [vmem:[#allocation7 + $0x8] sm:$0xff] }
  0x30   :  { %330 = vmatprep.subr.mxu0 %v74_v8  ;;  %362 = vmatpush3.msra.mxu1 %v176_v11  ;;  %v167_v30 = vld [vmem:[#allocation7 + $0x18] sm:$0xff]  ;;  %v164_v33 = vld [vmem:[#allocation7] sm:$0xff]  ;;  %v282_v34 = vld [vmem:[%s550_s2] ss:$0 sm:$0xff]  ;;  %s456_s2 = scalar_lea.vmem %s270_s12, 256 }
  0x31   :  { %331 = vmatpush3.msra.mxu0 %v74_v8  ;;  %363 = vmatprep.subr.mxu1 %v175_v13  ;;  %v283_v41 = vld [vmem:[%s552_s4] ss:$0 sm:$0xff]  ;;  %p457_p1 = scmp.ne.s32.totalorder %s270_s12, %s456_s2  ;;  %p462_p3 = scmp.lt.s32.totalorder %s456_s2, %s456_s2 }
  0x32   :  { %332 = vmatprep.subr.mxu0 %v73_v10  ;;  %364 = vmatpush3.msra.mxu1 %v175_v13 }
  0x33   :  { %333 = vmatpush3.msra.mxu0 %v73_v10  ;;  %365 = vmatprep.subr.mxu1 %v174_v15  ;;  %p463_p4 = por %p462_p3, %p461_p2 }
  0x34   :  { %334 = vmatprep.subr.mxu0 %v72_v12  ;;  %366 = vmatpush3.msra.mxu1 %v174_v15 }
  0x35   :  { %335 = vmatpush3.msra.mxu0 %v72_v12  ;;  %367 = vmatprep.subr.mxu1 %v173_v17  ;;  %p464_p5 = pnand %p463_p4, %p457_p1 }
  0x36   :  { %336 = vmatprep.subr.mxu0 %v71_v14  ;;  %368 = vmatpush3.msra.mxu1 %v173_v17 }
  0x37   :  { %337 = vmatpush3.msra.mxu0 %v71_v14  ;;  %369 = vmatprep.subr.mxu1 %v172_v19 }
  0x38   :  { %338 = vmatprep.subr.mxu0 %v70_v16  ;;  %370 = vmatpush3.msra.mxu1 %v172_v19 }
  0x39   :  { %339 = vmatpush3.msra.mxu0 %v70_v16  ;;  %371 = vmatprep.subr.mxu1 %v171_v21 }
  0x3a   :  { %340 = vmatprep.subr.mxu0 %v69_v18  ;;  %372 = vmatpush3.msra.mxu1 %v171_v21 }
  0x3b   :  { %341 = vmatpush3.msra.mxu0 %v69_v18  ;;  %373 = vmatprep.subr.mxu1 %v170_v23 }
  0x3c   :  { %342 = vmatprep.subr.mxu0 %v68_v20  ;;  %374 = vmatpush3.msra.mxu1 %v170_v23 }
  0x3d   :  { %343 = vmatpush3.msra.mxu0 %v68_v20  ;;  %375 = vmatprep.subr.mxu1 %v169_v25 }
  0x3e   :  { %344 = vmatprep.subr.mxu0 %v67_v22  ;;  %376 = vmatpush3.msra.mxu1 %v169_v25 }
  0x3f   :  { %345 = vmatpush3.msra.mxu0 %v67_v22  ;;  %377 = vmatprep.subr.mxu1 %v168_v27 }
  0x40   :  { %346 = vmatprep.subr.mxu0 %v66_v24  ;;  %378 = vmatpush3.msra.mxu1 %v168_v27 }
  0x41   :  { %347 = vmatpush3.msra.mxu0 %v66_v24  ;;  %379 = vmatprep.subr.mxu1 %v167_v30 }
  0x42   :  { %348 = vmatprep.subr.mxu0 %v65_v26  ;;  %380 = vmatpush3.msra.mxu1 %v167_v30 }
  0x43   :  { %349 = vmatpush3.msra.mxu0 %v65_v26  ;;  %381 = vmatprep.subr.mxu1 %v166_v31 }
  0x44   :  { %350 = vmatprep.subr.mxu0 %v64_v28  ;;  %382 = vmatpush3.msra.mxu1 %v166_v31 }
  0x45   :  { %351 = vmatpush3.msra.mxu0 %v64_v28  ;;  %383 = vmatprep.subr.mxu1 %v165_v32 }
  0x46   :  { %353 = vmatmul.mubr.f32.vlgmr.msra.gmra.mxu0 %v63_v29  ;;  %384 = vmatpush3.msra.mxu1 %v165_v32 }
  0x47   :  { %385 = vmatprep.subr.mxu1 %v164_v33 }
  0x48   :  { %386 = vmatpush3.msra.mxu1 %v164_v33 }
 0x106   :  { %v354_v35 = vpop.f32.mrf.mxu0 }
 0x107   :  { %v159_v36 = vadd.f32 %v354_v35, %v282_v34 }
 0x108   :  { %v153_v37 = vpop.f32.mrf.mxu0 }
 0x109   :  { %v154_v38 = vadd.f32 %v282_v34, %v153_v37  ;;  %v163_v40 = vmax.f32 %v159_v36, 0.0 }
 0x10b   :  { %v162_v39 = vmax.f32 %v154_v38, 0.0 }
 0x10d   :  { %387 = vmatprep.mubr.f32.mxu1 %v162_v39 }
 0x10e   :  { %388 = vmatmul.mubr.f32.vlgmr.msra.gmra.mxu1 %v163_v40 }
 0x1ce   :  { %v389_v42 = vpop.f32.mrf.mxu1 }
 0x1cf   :  { %v259_v43 = vadd.f32 %v389_v42, %v283_v41 }
 0x1d0   :  { %v253_v44 = vpop.f32.mrf.mxu1 }
 0x1d1   :  { %263 = vst [vmem:[#allocation8 + $0x8] sm:$0xff] %v259_v43  ;;  %v254_v45 = vadd.f32 %v283_v41, %v253_v44 }
 0x1d3   :  { %262 = vst [vmem:[#allocation8] sm:$0xff] %v254_v45 }
 0x1d4   :  { %467 = shalt.err (!%p464_p5)
}
 0x1d5   :  { %275 = dma.vmem_to_hbm [thread:$0]  %s270_s12, 256, %s553_s5, [#allocation4], %s484_s23, %s484_s23, %s485_s24  }
 0x1d6   :  { %480 = dma.done.wait [#allocation4], 256  }
 0x1d7   :  { %481 = vsyncadd [#allocation4], 4294967040 }
 0x1d8   :  { %279 = vsyncpa [#allocation3], 1 }
 0x1d9   :  { %280 = vsyncpa [#allocation6], 1 }
 0x1da   :  { %281 = vsyncpa [#allocation4], 1 }

</bundles_post_ra>
